<compile_context>
chip_gen: v7x
topology: tpu7x:2x2x1
jax: 0.10.0
libtpu: 0.0.40
codegen_flags: <defaults>
</compile_context>

<pallas_src>
import numpy as np
import jax
import jax.numpy as jnp
from jax import lax
from jax.experimental import pallas as pl
from jax.experimental.pallas import tpu as pltpu

_LANE = 128
_SUBLANE = 8
_MAX_LANE_BLOCK = 4096
_MIN_PALLAS_BYTES = 512 * 1024     # below this, let XLA handle the gather
_MIN_DMA_CHUNK_BYTES = 1024        # per-`pre` contiguous bytes needed for DMA path


def _round_up(x, m):
    return ((x + m - 1) // m) * m


def _largest_divisor(n, cap, multiple_of=1):
    """Largest d <= cap with d | n and multiple_of | d, else None."""
    cap = min(cap, n)
    for d in range(cap, 0, -1):
        if n % d == 0 and d % multiple_of == 0:
            return d
    return None


def _tpu_targets():
    """(block_target_bytes, vmem_limit_cap_bytes) tuned per TPU generation."""
    vmem_cap = 128 << 20
    try:
        info = pltpu.get_tpu_info()
        vmem_cap = int(getattr(info, "vmem_capacity_bytes", vmem_cap)) or vmem_cap
    except Exception:
        pass
    kind = ""
    try:
        kind = jax.devices()[0].device_kind.lower()
    except Exception:
        pass
    if vmem_cap <= (64 << 20) or "v7" in kind:
        # v7x: ~3.2 TB/s HBM but only 64 MiB VMEM -> big blocks, capped VMEM ask.
        return 6 << 20, max(24 << 20, min(48 << 20, vmem_cap - (16 << 20)))
    if "v5" in kind:
        # v5e: ~0.8 TB/s HBM; 2 MiB blocks already keep per-step overhead < 10%.
        return 2 << 20, 32 << 20
    # v6e (or unknown): ~1.4 TB/s HBM.
    return 4 << 20, 48 << 20


def _gather_copy_kernel(idx_ref, x_ref, o_ref):
    # idx_ref: (1,) int32 scalar-prefetch ref (consumed by the index_map only).
    # x_ref:   (pre_blk, 1, r_blk, c_blk) slice of x at the gathered index.
    # o_ref:   (pre_blk, r_blk, c_blk) output tile.
    del idx_ref
    o_ref[...] = x_ref[:, 0, :, :]


def _make_dma_kernel(chunks):
    """HBM->HBM gather copy: a few static DMAs split along `pre`."""
    def kernel(idx_ref, x_ref, o_ref, sem):
        # x_ref: (pre, da, post) in HBM; o_ref: (pre, 1, post) in HBM.
        i0 = idx_ref[0]
        copies = []
        for k, (st, sz) in enumerate(chunks):
            cp = pltpu.make_async_copy(
                x_ref.at[pl.ds(st, sz), pl.ds(i0, 1)],
                o_ref.at[pl.ds(st, sz)],
                sem.at[k])
            cp.start()
            copies.append(cp)
        for cp in copies:
            cp.wait()
    return kernel


def bound_gather_forward(x, indices, axis, *, mode="auto",
                         min_pallas_bytes=_MIN_PALLAS_BYTES,
                         block_target_bytes=None):
    """Pallas equivalent of BoundGather.forward (scalar index).

    Returns x gathered at `indices` along `axis`, with `axis` squeezed out.
    `indices` may be a Python int or a 0-d / 1-element integer array; its
    runtime value is handled via scalar prefetch / in-kernel DMA slicing.
    """
    x = jnp.asarray(x)
    axis = axis % x.ndim
    shape = tuple(int(s) for s in x.shape)
    out_shape = shape[:axis] + shape[axis + 1:]

    idx = jnp.asarray(indices)
    if idx.size != 1:
        # The reference module only supports scalar indices (it raises too).
        raise NotImplementedError("BoundGather: only scalar `indices` supported")
    idx = idx.reshape(()).astype(jnp.int32)

    pre = int(np.prod(shape[:axis], dtype=np.int64))
    da = shape[axis]
    post = int(np.prod(shape[axis + 1:], dtype=np.int64))
    total_out = pre * post
    if total_out == 0 or da == 0:
        return jnp.zeros(out_shape, dtype=x.dtype)

    # ONNX/PyTorch Gather allows negative indices; wrap + clamp so a bad value
    # never becomes an out-of-bounds HBM DMA (bounds checks are DMA-only).
    idx = jnp.clip(jnp.where(idx < 0, idx + da, idx), 0, da - 1)

    itemsize = jnp.dtype(x.dtype).itemsize
    out_bytes = total_out * itemsize

    if mode == "auto":
        if out_bytes < min_pallas_bytes:
            mode = "xla"
        elif post * itemsize >= _MIN_DMA_CHUNK_BYTES:
            mode = "dma"
        else:
            mode = "blocks"
    assert mode in ("xla", "dma", "blocks")

    if mode == "xla":
        # Tiny gather: custom-call launch overhead dwarfs the copy; let XLA fuse it.
        return lax.dynamic_index_in_dim(x, idx, axis, keepdims=False)

    idx1 = idx.reshape((1,))
    tgt, vmem_cap = _tpu_targets()
    if block_target_bytes is not None:
        tgt = int(block_target_bytes)
    cost = pl.CostEstimate(flops=0, transcendentals=0, bytes_accessed=2 * out_bytes)

    if mode == "dma":
        # Direct HBM->HBM strided DMA: no VMEM round trip, no per-step overhead.
        x3 = x.reshape(pre, da, post)
        n_chunks = min(4, pre)                         # a few DMA engines in flight
        base, rem = divmod(pre, n_chunks)
        chunks, st = [], 0
        for k in range(n_chunks):
            sz = base + (1 if k < rem else 0)
            chunks.append((st, sz))
            st += sz
        out3 = pl.pallas_call(
            _make_dma_kernel(tuple(chunks)),
            out_shape=jax.ShapeDtypeStruct((pre, 1, post), x.dtype),
            grid_spec=pltpu.PrefetchScalarGridSpec(
                num_scalar_prefetch=1,
                grid=(1,),
                in_specs=[pl.BlockSpec(memory_space=pl.ANY)],
                out_specs=pl.BlockSpec(memory_space=pl.ANY),
                scratch_shapes=[pltpu.SemaphoreType.DMA((len(chunks),))]),
            compiler_params=pltpu.CompilerParams(
                dimension_semantics=("arbitrary",)),
            cost_estimate=cost,
        )(idx1, x3)
        return out3.reshape(out_shape)

    # ---- mode == "blocks": tiled VMEM streaming copy -------------------------
    sub = _SUBLANE * max(1, 4 // itemsize)             # dtype-native sublane packing

    # Lane-dense factorization post = R * C (C a multiple of 128 when possible).
    if post % _LANE == 0:
        C = _largest_divisor(post, _MAX_LANE_BLOCK, multiple_of=_LANE)
        R = post // C
    else:
        C, R = post, 1

    # Block sizes need not divide the dims: the grid uses cdiv and Pallas pads
    # edge reads / masks edge writes (harmless for a pure copy).
    c_blk = C if C <= _MAX_LANE_BLOCK else _MAX_LANE_BLOCK     # 4096 is 128-aligned
    row_bytes = _round_up(c_blk, _LANE) * itemsize
    r_blk = min(R, max(1, tgt // row_bytes))
    if r_blk < R:
        r_blk = min(R, max(sub, (r_blk // sub) * sub))
    per_pre = _round_up(r_blk, sub) * row_bytes
    pre_blk = min(pre, max(1, tgt // per_pre))

    def _grid():
        return (pl.cdiv(pre, pre_blk), pl.cdiv(R, r_blk), pl.cdiv(C, c_blk))

    # v7x has 2 TensorCores: keep >= 2 "parallel" grid steps when the copy is
    # big enough that splitting is cheaper than idling a core (harmless on 1-TC).
    if int(np.prod(_grid())) < 2 and out_bytes >= (1 << 20):
        if R >= 2 * sub:
            r_blk = _round_up(R // 2, sub)
        elif pre >= 2:
            pre_blk = pl.cdiv(pre, 2)
        elif C >= 2 * _LANE:
            c_blk = _round_up(C // 2, _LANE)
    grid = _grid()

    block_bytes = (pre_blk * _round_up(r_blk, sub)
                   * _round_up(c_blk, _LANE) * itemsize)
    est_vmem = 4 * block_bytes + (2 << 20)             # in + out, double-buffered
    vmem_limit = int(min(vmem_cap, max(est_vmem, 32 << 20)))

    x4 = x.reshape(pre, da, R, C)
    out3 = pl.pallas_call(
        _gather_copy_kernel,
        out_shape=jax.ShapeDtypeStruct((pre, R, C), x.dtype),
        grid_spec=pltpu.PrefetchScalarGridSpec(
            num_scalar_prefetch=1,
            grid=grid,
            in_specs=[pl.BlockSpec(
                (pre_blk, 1, r_blk, c_blk),
                lambda pi, ri, ci, idx_ref: (pi, idx_ref[0], ri, ci))],
            out_specs=pl.BlockSpec(
                (pre_blk, r_blk, c_blk),
                lambda pi, ri, ci, idx_ref: (pi, ri, ci)),
        ),
        compiler_params=pltpu.CompilerParams(
            dimension_semantics=("parallel", "parallel", "parallel"),
            vmem_limit_bytes=vmem_limit),
        cost_estimate=cost,
    )(idx1, x4)
    return out3.reshape(out_shape)


if __name__ == "__main__":
    key = jax.random.PRNGKey(0)

    # BoundGather on an activation: x (batch=2, channels=4, 16, 16), gather
    # channel 2 along axis=1 with a 0-dim runtime index.
    x = jax.random.normal(key, (2, 4, 16, 16), dtype=jnp.float32)
    idx = jnp.array(2, dtype=jnp.int32)
    ref = jnp.take(x, 2, axis=1)   # == torch.index_select(x, 1, idx).squeeze(1)

    # Tiled (BlockSpec-pipelined) Pallas path.
    out_blk = jax.block_until_ready(bound_gather_forward(x, idx, 1, mode="blocks"))
    assert out_blk.shape == ref.shape and out_blk.dtype == ref.dtype
    np.testing.assert_allclose(np.asarray(out_blk), np.asarray(ref), rtol=0, atol=0)

    # Direct HBM->HBM DMA Pallas path.
    out_dma = jax.block_until_ready(bound_gather_forward(x, idx, 1, mode="dma"))
    np.testing.assert_allclose(np.asarray(out_dma), np.asarray(ref), rtol=0, atol=0)

    # Auto mode: tiny output takes the XLA fallback (fusable, no launch overhead).
    out_auto = jax.block_until_ready(bound_gather_forward(x, idx, 1))
    np.testing.assert_allclose(np.asarray(out_auto), np.asarray(ref), rtol=0, atol=0)

    # axis = 0 (select one batch element), both Pallas paths.
    ref0 = jnp.take(x, 1, axis=0)
    for m in ("blocks", "dma"):
        o = jax.block_until_ready(
            bound_gather_forward(x, jnp.array(1, jnp.int32), 0, mode=m))
        np.testing.assert_allclose(np.asarray(o), np.asarray(ref0), rtol=0, atol=0)

    # Negative index (ONNX/PyTorch Gather semantics): -1 == last channel.
    out_neg = jax.block_until_ready(
        bound_gather_forward(x, jnp.array(-1, jnp.int32), 1, mode="blocks"))
    np.testing.assert_allclose(np.asarray(out_neg), np.asarray(jnp.take(x, 3, axis=1)),
                               rtol=0, atol=0)

    # Multi-block / partial-edge exercise of the tiled path: a tiny block target
    # forces a (pre, R) grid with a ragged sublane edge (cdiv tiling).
    x2 = jax.random.normal(jax.random.PRNGKey(1), (2, 3, 12, 4096), dtype=jnp.float32)
    out2 = jax.block_until_ready(
        bound_gather_forward(x2, jnp.array(1, jnp.int32), 1,
                             mode="blocks", block_target_bytes=64 * 1024))
    np.testing.assert_allclose(np.asarray(out2), np.asarray(jnp.take(x2, 1, axis=1)),
                               rtol=0, atol=0)

    # torch.Size-style input: x is a 1-D shape tensor, scalar index picks one dim.
    shape_tensor = jnp.array([2, 4, 16, 16], dtype=jnp.int32)
    out_s = jax.block_until_ready(
        bound_gather_forward(shape_tensor, jnp.array(3, jnp.int32), 0))
    assert out_s.shape == () and int(out_s) == 16

    print("KERNEL_OK")
</pallas_src>

<mosaic_0001>
module attributes {stable_mosaic.version = 11 : i64} {
  func.func @_gather_copy_kernel(%arg0: i32, %arg1: i32, %arg2: i32, %arg3: memref<1xi32, #tpu.memory_space<smem>>, %arg4: memref<2x1x1x256xf32, #tpu.memory_space<vmem>>, %arg5: memref<2x1x256xf32, #tpu.memory_space<vmem>>) attributes {dimension_semantics = [#tpu.dimension_semantics<parallel>, #tpu.dimension_semantics<parallel>, #tpu.dimension_semantics<parallel>], iteration_bounds = array<i64: 1, 1, 1>, scalar_prefetch = 1 : i64, scratch_operands = 0 : i64, tpu.core_type = #tpu.core_type<tc>, window_params = [{transform_indices = @transform_0, window_bounds = array<i64: 2, 1, 1, 256>}, {transform_indices = @transform_1, window_bounds = array<i64: 2, 1, 256>}]} {
    %c0 = arith.constant 0 : index
    %c0_0 = arith.constant 0 : index
    %c0_1 = arith.constant 0 : index
    %c0_2 = arith.constant 0 : index
    %0 = vector.load %arg4[%c0, %c0_0, %c0_1, %c0_2] : memref<2x1x1x256xf32, #tpu.memory_space<vmem>>, vector<2x1x1x256xf32>
    %1 = vector.shape_cast %0 : vector<2x1x1x256xf32> to vector<2x1x256xf32>
    %c0_3 = arith.constant 0 : index
    %c0_4 = arith.constant 0 : index
    %c0_5 = arith.constant 0 : index
    %2 = vector.load %arg5[%c0_3, %c0_4, %c0_5] : memref<2x1x256xf32, #tpu.memory_space<vmem>>, vector<2x1x256xf32>
    tpu.vector_store %arg5[%c0_3, %c0_4, %c0_5], %1 {strides = array<i32>} : memref<2x1x256xf32, #tpu.memory_space<vmem>>, vector<2x1x256xf32>,
    return
  }
  func.func @transform_0(%arg0: i32, %arg1: i32, %arg2: i32, %arg3: memref<1xi32, #tpu.memory_space<smem>>) -> (i32, i32, i32, i32) {
    %c0 = arith.constant 0 : index
    %0 = memref.load %arg3[%c0] : memref<1xi32, #tpu.memory_space<smem>>
    %c0_i32 = arith.constant 0 : i32
    return %arg0, %0, %arg1, %arg2 : i32, i32, i32, i32
  }
  func.func @transform_1(%arg0: i32, %arg1: i32, %arg2: i32, %arg3: memref<1xi32, #tpu.memory_space<smem>>) -> (i32, i32, i32) {
    %c0_i32 = arith.constant 0 : i32
    return %arg0, %arg1, %arg2 : i32, i32, i32
  }
}

</mosaic_0001>

<bundles_post_ra>
// kernel: tpu_custom_call.1
= control target key start
LH: loop header
LB: loop body
LE: loop exit
PB: predicated region body
PF: predicated region fallthrough
CT: control target
= control target key end

     0   :  { %8 = vsyncpa [#allocation5], 0  ;;  %s159_s0 = inlined_call_operand.<no memory space> [shape: s32[1], index: 0, kind: input, shape index: {}]   ;;  %s160_s1 = inlined_call_operand.hbm [shape: f32[2,4,1,256], index: 1, kind: input, shape index: {}]   ;;  %s161_s2 = inlined_call_operand.hbm [shape: f32[2,1,256], index: 2, kind: output, shape index: {}]  }
   0x1   :  { %9 = vsyncpa [#allocation6], 0  ;;  %s59_s11 = sshll.u32 %s159_s0, 5  ;;  %s115_s15 = smov [#allocation4]  }
   0x2   :  { %s18_s14 = scalar_lea.hbm %s160_s1, %s59_s11  ;;  %s19_s16 = sshll.u32 %s115_s15, 4  ;;  %s20_s16 = int_to_ptr.vmem [resolvable:$true] %s19_s16 }
   0x3   :  { %s65_s17 = scalar_lea.hbm %s18_s14, 64  ;;  %s67_s20 = scalar_lea.hbm %s160_s1, 256 }
   0x4   :  { %p66_p0 = scmp.ne.s32.totalorder %s18_s14, %s65_s17  ;;  %p68_p1 = scmp.lt.u32.totalorder %s18_s14, %s160_s1 }
   0x5   :  { %p69_p2 = scmp.lt.u32.totalorder %s67_s20, %s65_s17  ;;  %p71_p4 = scmp.lt.u32.totalorder %s65_s17, %s18_s14 }
   0x7   :  { %p70_p3 = por %p69_p2, %p68_p1 }
   0x9   :  { %p72_p5 = por %p71_p4, %p70_p3 }
   0xb   :  { %p73_p6 = pnand %p72_p5, %p66_p0 }
   0xd   :  { %76 = shalt.err (!%p73_p6)
}
   0xe   :  { %s77_s0 = scalar_lea.vmem %s20_s16, 64  ;;  %p82_p8 = scmp.lt.s32.totalorder %s20_s16, %s20_s16 }
   0xf   :  { %p78_p7 = scmp.ne.s32.totalorder %s20_s16, %s77_s0  ;;  %p83_p9 = scmp.lt.s32.totalorder %s77_s0, %s77_s0 }
  0x11   :  { %p84_p10 = por %p83_p9, %p82_p8 }
  0x13   :  { %p85_p11 = pnand %p84_p10, %p78_p7 }
  0x15   :  { %88 = shalt.err (!%p85_p11)
}
  0x16   :  { %s116_s23 = smov 128   ;;  %s117_s24 = smov 32  }
  0x17   :  { %s118_s25 = smov 2  }
  0x18   :  { %25 = dma.hbm_to_vmem [thread:$0]  %s18_s14, 64, %s20_s16, [#allocation5], %s116_s23, %s117_s24, %s118_s25  }
  0x19   :  { %111 = dma.done.wait [#allocation5], 64  }
  0x1a   :  { %112 = vsyncadd [#allocation5], 4294967232  ;;  %v32_v0 = vlaneseq  ;;  %s119_s1 = smov [#allocation7]   ;;  %v30_v1 = vld [vmem:[#allocation4] sm:$0x3] }
  0x1b   :  { %s43_s26 = sshll.u32 %s119_s1, 4  ;;  %v31_v2 = vld [vmem:[#allocation4 + $0x2] sm:$0x3]  ;;  %s44_s26 = int_to_ptr.vmem [resolvable:$true] %s43_s26 }
  0x1c   :  { %vm34_vm0 = vcmp.lt.s32.totalorder %v32_v0, 256  ;;  %s89_s27 = scalar_lea.vmem %s44_s26, 64  ;;  %p94_p13 = scmp.lt.s32.totalorder %s44_s26, %s44_s26 }
  0x1d   :  { %36 = vst.msk [vmem:[#allocation7] sm:$0x3] %vm34_vm0, %v30_v1  ;;  %37 = vst.msk [vmem:[#allocation7 + $0x2] sm:$0x3] %vm34_vm0, %v31_v2  ;;  %p90_p12 = scmp.ne.s32.totalorder %s44_s26, %s89_s27  ;;  %p95_p0 = scmp.lt.s32.totalorder %s89_s27, %s89_s27 }
  0x1f   :  { %p96_p1 = por %p95_p0, %p94_p13 }
  0x21   :  { %p97_p2 = pnand %p96_p1, %p90_p12 }
  0x23   :  { %100 = shalt.err (!%p97_p2)
}
  0x24   :  { %s101_s30 = scalar_lea.hbm %s161_s2, 64 }
  0x25   :  { %p102_p3 = scmp.ne.s32.totalorder %s161_s2, %s101_s30  ;;  %p105_p4 = scmp.lt.u32.totalorder %s101_s30, %s161_s2 }
  0x27   :  { %p107_p5 = pnand %p105_p4, %p102_p3 }
  0x29   :  { %110 = shalt.err (!%p107_p5)
}
  0x2a   :  { %49 = dma.vmem_to_hbm [thread:$0]  %s44_s26, 64, %s161_s2, [#allocation6], %s117_s24, %s117_s24, %s118_s25  }
  0x2b   :  { %113 = dma.done.wait [#allocation6], 64  }
  0x2c   :  { %114 = vsyncadd [#allocation6], 4294967232 }
  0x2d   :  { %53 = vsyncpa [#allocation5], 1 }
  0x2e   :  { %54 = vsyncpa [#allocation6], 1 }

</bundles_post_ra>
